<compile_context>
chip_gen: v6e
topology: v6e:2x2x1
jax: 0.10.0
libtpu: 0.0.40
codegen_flags: <defaults>
</compile_context>

<pallas_src>
import functools

import jax
import jax.numpy as jnp
import numpy as np
from jax.experimental import pallas as pl
from jax.experimental.pallas import tpu as pltpu

_LANE = 128
_SUB = 8


def _round_up(x, m):
    return ((x + m - 1) // m) * m


def _dice_kernel(pred_ref, targ_ref, inter_ref, total_ref, *, n_valid):
    c = pl.program_id(0)          # TensorCore split axis ("parallel")
    i = pl.program_id(1)          # sequential streaming axis ("arbitrary")
    steps = pl.num_programs(1)
    tile_rows, lane = pred_ref.shape
    tile_elems = tile_rows * lane

    @pl.when(i == 0)
    def _():
        inter_ref[...] = jnp.zeros_like(inter_ref)
        total_ref[...] = jnp.zeros_like(total_ref)

    # Logical (unclamped) tile index -> valid element count for this tile.
    # int32 math: valid for n < 2**31 elements.
    blk = c * steps + i
    rem = n_valid - blk * tile_elems

    x = pred_ref[...].astype(jnp.float32)
    # sigmoid(x) = 0.5 * (tanh(x / 2) + 1): a single EUP op per element.
    p = 0.5 * jnp.tanh(0.5 * x) + 0.5
    t = targ_ref[...].astype(jnp.float32)

    def _accum(p_v, t_v):
        # Lane-dense (8,128) partial sums: the reduction over whole vregs stays
        # on the VPU; the cross-lane reduce to scalars happens in the wrapper.
        p3 = p_v.reshape(tile_rows // _SUB, _SUB, lane)
        t3 = t_v.reshape(tile_rows // _SUB, _SUB, lane)
        inter_ref[0, :, :] = inter_ref[0, :, :] + jnp.sum(p3 * t3, axis=0)
        total_ref[0, :, :] = total_ref[0, :, :] + jnp.sum(p3 + t3, axis=0)

    @pl.when(rem >= tile_elems)      # steady state: full tile, no masking work
    def _():
        _accum(p, t)

    @pl.when(rem < tile_elems)       # ragged / duplicated trailing tile only
    def _():
        row = jax.lax.broadcasted_iota(jnp.int32, (tile_rows, lane), 0)
        col = jax.lax.broadcasted_iota(jnp.int32, (tile_rows, lane), 1)
        valid = (row * lane + col) < rem
        # Mask both operands: past-the-end buffer contents are arbitrary since
        # the host no longer pads the array out to a whole number of tiles.
        _accum(jnp.where(valid, p, 0.0), jnp.where(valid, t, 0.0))


def dice_loss(pred, target, *, smooth=1.0, tile_rows=4096):
    """Pallas equivalent of DiceLoss.forward(inputs, targets, smooth=1)."""
    flat_p = pred.reshape(-1)          # native dtype; upcast happens in-kernel
    flat_t = target.reshape(-1)
    n = int(flat_p.shape[0])

    # Lane-dense (rows, 128) slab.  Only the < 128-element remainder is padded
    # (and only when n is not lane-aligned); the kernel masks the tail anyway.
    rows = pl.cdiv(n, _LANE)
    pad = rows * _LANE - n
    if pad:
        flat_p = jnp.pad(flat_p, (0, pad))
        flat_t = jnp.pad(flat_t, (0, pad))
    p2d = flat_p.reshape(rows, _LANE)
    t2d = flat_t.reshape(rows, _LANE)

    # dtype-aware sublane multiple: 8 rows for 32-bit, 16 for bf16, 32 for 8-bit.
    def _row_mult(dt):
        return _SUB * max(1, 4 // jnp.dtype(dt).itemsize)

    row_mult = max(_row_mult(pred.dtype), _row_mult(target.dtype))
    tile_rows = max(row_mult,
                    min(_round_up(int(tile_rows), row_mult),
                        _round_up(rows, row_mult)))

    grid_n = pl.cdiv(rows, tile_rows)        # logical number of tiles
    n_split = 2 if grid_n > 1 else 1         # 2-TensorCore split (v7x megacore)
    steps = pl.cdiv(grid_n, n_split)

    def in_map(c, i):
        # Clamp so the (possibly empty) trailing tile of the second core stays
        # in bounds; its contribution is fully masked in-kernel via `rem`.
        return (jnp.minimum(c * steps + i, grid_n - 1), 0)

    out_map = lambda c, i: (c, 0, 0)

    kernel = functools.partial(_dice_kernel, n_valid=n)

    itemsize = jnp.dtype(pred.dtype).itemsize + jnp.dtype(target.dtype).itemsize
    cost = pl.CostEstimate(
        flops=6 * n,                 # tanh scaling + p*t + two accumulations
        transcendentals=n,           # one tanh per element
        bytes_accessed=n * itemsize + 2 * n_split * _SUB * _LANE * 4,
    )

    inter_parts, total_parts = pl.pallas_call(
        kernel,
        out_shape=(
            jax.ShapeDtypeStruct((n_split, _SUB, _LANE), jnp.float32),
            jax.ShapeDtypeStruct((n_split, _SUB, _LANE), jnp.float32),
        ),
        grid_spec=pltpu.PrefetchScalarGridSpec(
            num_scalar_prefetch=0,
            grid=(n_split, steps),
            in_specs=[
                pl.BlockSpec((tile_rows, _LANE), in_map),
                pl.BlockSpec((tile_rows, _LANE), in_map),
            ],
            out_specs=[
                pl.BlockSpec((1, _SUB, _LANE), out_map),
                pl.BlockSpec((1, _SUB, _LANE), out_map),
            ],
        ),
        compiler_params=pltpu.CompilerParams(
            dimension_semantics=("parallel", "arbitrary"),
            vmem_limit_bytes=32 * 1024 * 1024,
        ),
        cost_estimate=cost,
    )(p2d, t2d)

    inter = jnp.sum(inter_parts)
    total = jnp.sum(total_parts)     # = sum(sigmoid(pred)) + sum(target)
    return 1.0 - (2.0 * inter + smooth) / (total + smooth)


def _dice_loss_ref(pred, target, smooth=1.0):
    p = jax.nn.sigmoid(pred.astype(jnp.float32)).reshape(-1)
    t = target.astype(jnp.float32).reshape(-1)
    inter = jnp.sum(p * t)
    dice = (2.0 * inter + smooth) / (jnp.sum(p) + jnp.sum(t) + smooth)
    return 1.0 - dice


if __name__ == "__main__":
    key = jax.random.PRNGKey(0)
    k1, k2 = jax.random.split(key)

    # Segmentation-style logits / binary mask: NCHW = (2, 4, 16, 16)
    pred = jax.random.normal(k1, (2, 4, 16, 16), dtype=jnp.float32)
    target = (jax.random.uniform(k2, (2, 4, 16, 16)) > 0.5).astype(jnp.float32)

    loss = jax.block_until_ready(dice_loss(pred, target))
    ref = jax.block_until_ready(_dice_loss_ref(pred, target))

    assert np.allclose(np.asarray(loss), np.asarray(ref), rtol=1e-5, atol=1e-5), (
        loss,
        ref,
    )
    print("KERNEL_OK")
</pallas_src>

<mosaic_0001>
module attributes {stable_mosaic.version = 11 : i64} {
  func.func @_dice_kernel(%arg0: i32, %arg1: i32, %arg2: memref<16x128xf32, #tpu.memory_space<vmem>>, %arg3: memref<16x128xf32, #tpu.memory_space<vmem>>, %arg4: memref<1x8x128xf32, #tpu.memory_space<vmem>>, %arg5: memref<1x8x128xf32, #tpu.memory_space<vmem>>) attributes {dimension_semantics = [#tpu.dimension_semantics<parallel>, #tpu.dimension_semantics<arbitrary>], iteration_bounds = array<i64: 1, 1>, scalar_prefetch = 0 : i64, scratch_operands = 0 : i64, tpu.core_type = #tpu.core_type<tc>, window_params = [{transform_indices = @transform_0, window_bounds = array<i64: 16, 128>}, {transform_indices = @transform_1, window_bounds = array<i64: 16, 128>}, {transform_indices = @transform_2, window_bounds = array<i64: 1, 8, 128>}, {transform_indices = @transform_3, window_bounds = array<i64: 1, 8, 128>}]} {
    %c0_i32 = arith.constant 0 : i32
    %0 = arith.cmpi eq, %arg1, %c0_i32 : i32
    %1 = arith.extui %0 : i1 to i32
    %c0_i32_0 = arith.constant 0 : i32
    %2 = arith.cmpi ne, %1, %c0_i32_0 : i32
    scf.if %2 {
      %cst_11 = arith.constant 0.000000e+00 : f32
      %22 = vector.broadcast %cst_11 : f32 to vector<1x8x128xf32>
      %c0_12 = arith.constant 0 : index
      %c0_13 = arith.constant 0 : index
      %c0_14 = arith.constant 0 : index
      %23 = vector.load %arg4[%c0_12, %c0_13, %c0_14] : memref<1x8x128xf32, #tpu.memory_space<vmem>>, vector<1x8x128xf32>
      tpu.vector_store %arg4[%c0_12, %c0_13, %c0_14], %22 {strides = array<i32>} : memref<1x8x128xf32, #tpu.memory_space<vmem>>, vector<1x8x128xf32>,
      %cst_15 = arith.constant 0.000000e+00 : f32
      %24 = vector.broadcast %cst_15 : f32 to vector<1x8x128xf32>
      %c0_16 = arith.constant 0 : index
      %c0_17 = arith.constant 0 : index
      %c0_18 = arith.constant 0 : index
      %25 = vector.load %arg5[%c0_16, %c0_17, %c0_18] : memref<1x8x128xf32, #tpu.memory_space<vmem>>, vector<1x8x128xf32>
      tpu.vector_store %arg5[%c0_16, %c0_17, %c0_18], %24 {strides = array<i32>} : memref<1x8x128xf32, #tpu.memory_space<vmem>>, vector<1x8x128xf32>,
    } else {
    }
    %c1_i32 = arith.constant 1 : i32
    %3 = arith.muli %arg0, %c1_i32 : i32
    %4 = arith.addi %3, %arg1 : i32
    %c2048_i32 = arith.constant 2048 : i32
    %5 = arith.muli %4, %c2048_i32 : i32
    %c2048_i32_1 = arith.constant 2048 : i32
    %6 = arith.subi %c2048_i32_1, %5 : i32
    %c0 = arith.constant 0 : index
    %c0_2 = arith.constant 0 : index
    %7 = vector.load %arg2[%c0, %c0_2] : memref<16x128xf32, #tpu.memory_space<vmem>>, vector<16x128xf32>
    %cst = arith.constant 5.000000e-01 : f32
    %8 = vector.broadcast %cst : f32 to vector<16x128xf32>
    %9 = arith.mulf %8, %7 : vector<16x128xf32>
    %10 = math.tanh %9 : vector<16x128xf32>
    %cst_3 = arith.constant 5.000000e-01 : f32
    %11 = vector.broadcast %cst_3 : f32 to vector<16x128xf32>
    %12 = arith.mulf %11, %10 : vector<16x128xf32>
    %cst_4 = arith.constant 5.000000e-01 : f32
    %13 = vector.broadcast %cst_4 : f32 to vector<16x128xf32>
    %14 = arith.addf %12, %13 : vector<16x128xf32>
    %c0_5 = arith.constant 0 : index
    %c0_6 = arith.constant 0 : index
    %15 = vector.load %arg3[%c0_5, %c0_6] : memref<16x128xf32, #tpu.memory_space<vmem>>, vector<16x128xf32>
    %c2048_i32_7 = arith.constant 2048 : i32
    %16 = arith.cmpi sge, %6, %c2048_i32_7 : i32
    %17 = arith.extui %16 : i1 to i32
    %c0_i32_8 = arith.constant 0 : i32
    %18 = arith.cmpi ne, %17, %c0_i32_8 : i32
    scf.if %18 {
      %22 = vector.shape_cast %14 : vector<16x128xf32> to vector<2x8x128xf32>
      %23 = vector.shape_cast %15 : vector<16x128xf32> to vector<2x8x128xf32>
      %c0_11 = arith.constant 0 : index
      %c0_12 = arith.constant 0 : index
      %c0_13 = arith.constant 0 : index
      %24 = vector.load %arg4[%c0_11, %c0_12, %c0_13] : memref<1x8x128xf32, #tpu.memory_space<vmem>>, vector<1x8x128xf32>
      %25 = vector.shape_cast %24 : vector<1x8x128xf32> to vector<8x128xf32>
      %26 = arith.mulf %22, %23 : vector<2x8x128xf32>
      %cst_14 = arith.constant dense<0.000000e+00> : vector<8x128xf32>
      %27 = vector.multi_reduction <add>, %26, %cst_14 [0] : vector<2x8x128xf32> to vector<8x128xf32>
      %28 = arith.addf %25, %27 : vector<8x128xf32>
      %c0_15 = arith.constant 0 : index
      %c0_16 = arith.constant 0 : index
      %c0_17 = arith.constant 0 : index
      %29 = vector.load %arg4[%c0_15, %c0_16, %c0_17] : memref<1x8x128xf32, #tpu.memory_space<vmem>>, vector<1x8x128xf32>
      %30 = vector.shape_cast %29 : vector<1x8x128xf32> to vector<8x128xf32>
      %31 = vector.shape_cast %28 : vector<8x128xf32> to vector<1x8x128xf32>
      tpu.vector_store %arg4[%c0_15, %c0_16, %c0_17], %31 {strides = array<i32>} : memref<1x8x128xf32, #tpu.memory_space<vmem>>, vector<1x8x128xf32>,
      %c0_18 = arith.constant 0 : index
      %c0_19 = arith.constant 0 : index
      %c0_20 = arith.constant 0 : index
      %32 = vector.load %arg5[%c0_18, %c0_19, %c0_20] : memref<1x8x128xf32, #tpu.memory_space<vmem>>, vector<1x8x128xf32>
      %33 = vector.shape_cast %32 : vector<1x8x128xf32> to vector<8x128xf32>
      %34 = arith.addf %22, %23 : vector<2x8x128xf32>
      %cst_21 = arith.constant dense<0.000000e+00> : vector<8x128xf32>
      %35 = vector.multi_reduction <add>, %34, %cst_21 [0] : vector<2x8x128xf32> to vector<8x128xf32>
      %36 = arith.addf %33, %35 : vector<8x128xf32>
      %c0_22 = arith.constant 0 : index
      %c0_23 = arith.constant 0 : index
      %c0_24 = arith.constant 0 : index
      %37 = vector.load %arg5[%c0_22, %c0_23, %c0_24] : memref<1x8x128xf32, #tpu.memory_space<vmem>>, vector<1x8x128xf32>
      %38 = vector.shape_cast %37 : vector<1x8x128xf32> to vector<8x128xf32>
      %39 = vector.shape_cast %36 : vector<8x128xf32> to vector<1x8x128xf32>
      tpu.vector_store %arg5[%c0_22, %c0_23, %c0_24], %39 {strides = array<i32>} : memref<1x8x128xf32, #tpu.memory_space<vmem>>, vector<1x8x128xf32>,
    } else {
    }
    %c2048_i32_9 = arith.constant 2048 : i32
    %19 = arith.cmpi slt, %6, %c2048_i32_9 : i32
    %20 = arith.extui %19 : i1 to i32
    %c0_i32_10 = arith.constant 0 : i32
    %21 = arith.cmpi ne, %20, %c0_i32_10 : i32
    scf.if %21 {
      %22 = tpu.iota {dimensions = array<i32: 0>} : vector<16x128xi32>
      %23 = tpu.iota {dimensions = array<i32: 1>} : vector<16x128xi32>
      %c128_i32 = arith.constant 128 : i32
      %24 = vector.broadcast %c128_i32 : i32 to vector<16x128xi32>
      %25 = arith.muli %22, %24 : vector<16x128xi32>
      %26 = arith.addi %25, %23 : vector<16x128xi32>
      %27 = vector.broadcast %6 : i32 to vector<16x128xi32>
      %28 = arith.cmpi slt, %26, %27 : vector<16x128xi32>
      %cst_11 = arith.constant 0.000000e+00 : f32
      %29 = vector.broadcast %cst_11 : f32 to vector<16x128xf32>
      %30 = arith.select %28, %14, %29 : vector<16x128xi1>, vector<16x128xf32>
      %cst_12 = arith.constant 0.000000e+00 : f32
      %31 = vector.broadcast %cst_12 : f32 to vector<16x128xf32>
      %32 = arith.select %28, %15, %31 : vector<16x128xi1>, vector<16x128xf32>
      %33 = vector.shape_cast %30 : vector<16x128xf32> to vector<2x8x128xf32>
      %34 = vector.shape_cast %32 : vector<16x128xf32> to vector<2x8x128xf32>
      %c0_13 = arith.constant 0 : index
      %c0_14 = arith.constant 0 : index
      %c0_15 = arith.constant 0 : index
      %35 = vector.load %arg4[%c0_13, %c0_14, %c0_15] : memref<1x8x128xf32, #tpu.memory_space<vmem>>, vector<1x8x128xf32>
      %36 = vector.shape_cast %35 : vector<1x8x128xf32> to vector<8x128xf32>
      %37 = arith.mulf %33, %34 : vector<2x8x128xf32>
      %cst_16 = arith.constant dense<0.000000e+00> : vector<8x128xf32>
      %38 = vector.multi_reduction <add>, %37, %cst_16 [0] : vector<2x8x128xf32> to vector<8x128xf32>
      %39 = arith.addf %36, %38 : vector<8x128xf32>
      %c0_17 = arith.constant 0 : index
      %c0_18 = arith.constant 0 : index
      %c0_19 = arith.constant 0 : index
      %40 = vector.load %arg4[%c0_17, %c0_18, %c0_19] : memref<1x8x128xf32, #tpu.memory_space<vmem>>, vector<1x8x128xf32>
      %41 = vector.shape_cast %40 : vector<1x8x128xf32> to vector<8x128xf32>
      %42 = vector.shape_cast %39 : vector<8x128xf32> to vector<1x8x128xf32>
      tpu.vector_store %arg4[%c0_17, %c0_18, %c0_19], %42 {strides = array<i32>} : memref<1x8x128xf32, #tpu.memory_space<vmem>>, vector<1x8x128xf32>,
      %c0_20 = arith.constant 0 : index
      %c0_21 = arith.constant 0 : index
      %c0_22 = arith.constant 0 : index
      %43 = vector.load %arg5[%c0_20, %c0_21, %c0_22] : memref<1x8x128xf32, #tpu.memory_space<vmem>>, vector<1x8x128xf32>
      %44 = vector.shape_cast %43 : vector<1x8x128xf32> to vector<8x128xf32>
      %45 = arith.addf %33, %34 : vector<2x8x128xf32>
      %cst_23 = arith.constant dense<0.000000e+00> : vector<8x128xf32>
      %46 = vector.multi_reduction <add>, %45, %cst_23 [0] : vector<2x8x128xf32> to vector<8x128xf32>
      %47 = arith.addf %44, %46 : vector<8x128xf32>
      %c0_24 = arith.constant 0 : index
      %c0_25 = arith.constant 0 : index
      %c0_26 = arith.constant 0 : index
      %48 = vector.load %arg5[%c0_24, %c0_25, %c0_26] : memref<1x8x128xf32, #tpu.memory_space<vmem>>, vector<1x8x128xf32>
      %49 = vector.shape_cast %48 : vector<1x8x128xf32> to vector<8x128xf32>
      %50 = vector.shape_cast %47 : vector<8x128xf32> to vector<1x8x128xf32>
      tpu.vector_store %arg5[%c0_24, %c0_25, %c0_26], %50 {strides = array<i32>} : memref<1x8x128xf32, #tpu.memory_space<vmem>>, vector<1x8x128xf32>,
    } else {
    }
    return
  }
  func.func @transform_0(%arg0: i32, %arg1: i32) -> (i32, i32) {
    %c1_i32 = arith.constant 1 : i32
    %0 = arith.muli %arg0, %c1_i32 : i32
    %1 = arith.addi %0, %arg1 : i32
    %c0_i32 = arith.constant 0 : i32
    %2 = arith.minsi %1, %c0_i32 : i32
    %c0_i32_0 = arith.constant 0 : i32
    %c0_i32_1 = arith.constant 0 : i32
    return %2, %c0_i32_0 : i32, i32
  }
  func.func @transform_1(%arg0: i32, %arg1: i32) -> (i32, i32) {
    %c1_i32 = arith.constant 1 : i32
    %0 = arith.muli %arg0, %c1_i32 : i32
    %1 = arith.addi %0, %arg1 : i32
    %c0_i32 = arith.constant 0 : i32
    %2 = arith.minsi %1, %c0_i32 : i32
    %c0_i32_0 = arith.constant 0 : i32
    %c0_i32_1 = arith.constant 0 : i32
    return %2, %c0_i32_0 : i32, i32
  }
  func.func @transform_2(%arg0: i32, %arg1: i32) -> (i32, i32, i32) {
    %c0_i32 = arith.constant 0 : i32
    %c0_i32_0 = arith.constant 0 : i32
    %c0_i32_1 = arith.constant 0 : i32
    return %arg0, %c0_i32, %c0_i32_0 : i32, i32, i32
  }
  func.func @transform_3(%arg0: i32, %arg1: i32) -> (i32, i32, i32) {
    %c0_i32 = arith.constant 0 : i32
    %c0_i32_0 = arith.constant 0 : i32
    %c0_i32_1 = arith.constant 0 : i32
    return %arg0, %c0_i32, %c0_i32_0 : i32, i32, i32
  }
}

</mosaic_0001>

<bundles_post_ra>
// kernel: tpu_custom_call.1
= control target key start
LH: loop header
LB: loop body
LE: loop exit
PB: predicated region body
PF: predicated region fallthrough
CT: control target
= control target key end

     0   :  { %9 = vsyncpa [#allocation3], 0  ;;  %s303_s0 = inlined_call_operand.hbm [shape: f32[16,128], index: 0, kind: input, shape index: {}]   ;;  %s304_s1 = inlined_call_operand.hbm [shape: f32[16,128], index: 1, kind: input, shape index: {}]   ;;  %s305_s2 = inlined_call_operand.hbm [shape: f32[1,8,128], index: 2, kind: output, shape index: {0}]   ;;  %s306_s3 = inlined_call_operand.hbm [shape: f32[1,8,128], index: 3, kind: output, shape index: {1}]  }
   0x1   :  { %10 = vsyncpa [#allocation6], 0 }
   0x2   :  { %11 = vsyncpa [#allocation4], 0 }
   0x3   :  { %12 = vsyncpa [#allocation9], 0  ;;  %s265_s12 = smov [#allocation2]  }
   0x4   :  { %s24_s13 = sshll.u32 %s265_s12, 4  ;;  %s25_s13 = int_to_ptr.vmem [resolvable:$true] %s24_s13 }
   0x5   :  { %s185_s14 = scalar_lea.vmem %s25_s13, 256  ;;  %p190_p1 = scmp.lt.s32.totalorder %s25_s13, %s25_s13 }
   0x6   :  { %p186_p0 = scmp.ne.s32.totalorder %s25_s13, %s185_s14  ;;  %p191_p2 = scmp.lt.s32.totalorder %s185_s14, %s185_s14 }
   0x8   :  { %p192_p3 = por %p191_p2, %p190_p1 }
   0xa   :  { %p193_p4 = pnand %p192_p3, %p186_p0 }
   0xc   :  { %196 = shalt.err (!%p193_p4)
}
   0xd   :  { %s266_s15 = smov 128   ;;  %s267_s16 = smov 8  }
   0xe   :  { %30 = dma.hbm_to_vmem [thread:$0]  %s303_s0, 256, %s25_s13, [#allocation3], %s266_s15, %s266_s15, %s267_s16  }
   0xf   :  { %s268_s19 = smov [#allocation5]  }
  0x10   :  { %s42_s20 = sshll.u32 %s268_s19, 4  ;;  %s43_s20 = int_to_ptr.vmem [resolvable:$true] %s42_s20 }
  0x11   :  { %s205_s21 = scalar_lea.vmem %s43_s20, 256  ;;  %p210_p6 = scmp.lt.s32.totalorder %s43_s20, %s43_s20 }
  0x12   :  { %p206_p5 = scmp.ne.s32.totalorder %s43_s20, %s205_s21  ;;  %p211_p7 = scmp.lt.s32.totalorder %s205_s21, %s205_s21 }
  0x14   :  { %p212_p8 = por %p211_p7, %p210_p6 }
  0x16   :  { %p213_p9 = pnand %p212_p8, %p206_p5 }
  0x18   :  { %216 = shalt.err (!%p213_p9)
}
  0x19   :  { %48 = dma.hbm_to_vmem [thread:$0]  %s304_s1, 256, %s43_s20, [#allocation6], %s266_s15, %s266_s15, %s267_s16  }
  0x1a   :  { %257 = dma.done.wait [#allocation3], 256  }
  0x1b   :  { %258 = vsyncadd [#allocation3], 4294967040 }
  0x1c   :  { %259 = dma.done.wait [#allocation6], 256  }
  0x1d   :  { %260 = vsyncadd [#allocation6], 4294967040  ;;  %v72_v0 = vld [vmem:[#allocation2] sm:$0xff]  ;;  %v73_v1 = vld [vmem:[#allocation2 + $0x8] sm:$0xff]  ;;  %s269_s0 = smov [#allocation7]   ;;  %s270_s24 = smov [#allocation8]  }
  0x1e   :  { %v74_v2 = vmul.f32 0.5, %v72_v0  ;;  %v75_v3 = vmul.f32 0.5, %v73_v1  ;;  %v82_v8 = vld [vmem:[#allocation5] sm:$0xff]  ;;  %v83_v10 = vld [vmem:[#allocation5 + $0x8] sm:$0xff]  ;;  %s138_s1 = sshll.u32 %s269_s0, 4  ;;  %s148_s25 = sshll.u32 %s270_s24, 4  ;;  %s139_s1 = int_to_ptr.vmem [resolvable:$true] %s138_s1  ;;  %s149_s25 = int_to_ptr.vmem [resolvable:$true] %s148_s25 }
  0x1f   :  { %s217_s26 = scalar_lea.vmem %s139_s1, 128  ;;  %p222_p11 = scmp.lt.s32.totalorder %s139_s1, %s139_s1 }
  0x20   :  { %173 = vtanh.f32 %v74_v2  ;;  %p218_p10 = scmp.ne.s32.totalorder %s139_s1, %s217_s26  ;;  %p223_p12 = scmp.lt.s32.totalorder %s217_s26, %s217_s26 }
  0x21   :  { %175 = vtanh.f32 %v75_v3 }
  0x22   :  { %p224_p13 = por %p223_p12, %p222_p11 }
  0x24   :  { %p225_p0 = pnand %p224_p13, %p218_p10 }
  0x2d   :  { %v174_v4 = vpop.eup %173 }
  0x2e   :  { %v176_v5 = vpop.eup %175  ;;  %v78_v6 = vmul.f32 0.5, %v174_v4 }
  0x2f   :  { %v79_v7 = vmul.f32 0.5, %v176_v5 }
  0x30   :  { %v80_v9 = vadd.f32 0.5, %v78_v6 }
  0x31   :  { %v81_v11 = vadd.f32 0.5, %v79_v7 }
  0x32   :  { %v89_v12 = vmul.f32 %v82_v8, %v80_v9  ;;  %v95_v13 = vadd.f32 %v82_v8, %v80_v9 }
  0x33   :  { %v90_v14 = vmul.f32 %v83_v10, %v81_v11  ;;  %v96_v15 = vadd.f32 %v83_v10, %v81_v11 }
  0x35   :  { %v91_v16 = vadd.f32 %v90_v14, %v89_v12  ;;  %v97_v17 = vadd.f32 %v96_v15, %v95_v13 }
  0x37   :  { %93 = vst [vmem:[#allocation7] sm:$0xff] %v91_v16  ;;  %99 = vst [vmem:[#allocation8] sm:$0xff] %v97_v17 }
  0x38   :  { %228 = shalt.err (!%p225_p0)
}
  0x39   :  { %141 = dma.vmem_to_hbm [thread:$0]  %s139_s1, 128, %s305_s2, [#allocation4]  }
  0x3a   :  { %s237_s29 = scalar_lea.vmem %s149_s25, 128  ;;  %p242_p2 = scmp.lt.s32.totalorder %s149_s25, %s149_s25 }
  0x3b   :  { %p238_p1 = scmp.ne.s32.totalorder %s149_s25, %s237_s29  ;;  %p243_p3 = scmp.lt.s32.totalorder %s237_s29, %s237_s29 }
  0x3d   :  { %p244_p4 = por %p243_p3, %p242_p2 }
  0x3f   :  { %p245_p5 = pnand %p244_p4, %p238_p1 }
  0x41   :  { %248 = shalt.err (!%p245_p5)
}
  0x42   :  { %151 = dma.vmem_to_hbm [thread:$0]  %s149_s25, 128, %s306_s3, [#allocation9]  }
  0x43   :  { %261 = dma.done.wait [#allocation4], 128  }
  0x44   :  { %262 = vsyncadd [#allocation4], 4294967168 }
  0x45   :  { %263 = dma.done.wait [#allocation9], 128  }
  0x46   :  { %264 = vsyncadd [#allocation9], 4294967168 }
  0x47   :  { %158 = vsyncpa [#allocation3], 1 }
  0x48   :  { %159 = vsyncpa [#allocation6], 1 }
  0x49   :  { %160 = vsyncpa [#allocation4], 1 }
  0x4a   :  { %161 = vsyncpa [#allocation9], 1 }

</bundles_post_ra>
